<compile_context>
chip_gen: v7x
topology: tpu7x:2x2x1
jax: 0.10.0
libtpu: 0.0.40
codegen_flags: <defaults>
</compile_context>

<pallas_src>
import math

import jax
import jax.numpy as jnp
from jax import lax
from jax.experimental import pallas as pl
from jax.experimental.pallas import tpu as pltpu


def _vmem_targets():
    """(target bytes for the x block, vmem_limit_bytes), per TPU generation."""
    block, limit = 4 * 1024 * 1024, 48 * 1024 * 1024   # safe on every generation
    try:
        vmem = int(pltpu.get_tpu_info().vmem_capacity_bytes)
        if vmem > 96 * 1024 * 1024:          # v5e / v6e: 128 MiB physical VMEM
            block, limit = 6 * 1024 * 1024, 64 * 1024 * 1024
        # else: v7x-class (64 MiB per TensorCore) -> keep 4 MiB / 48 MiB
    except Exception:
        pass
    return block, limit


def _pick_lane(flat_padded: int) -> int:
    """Largest lane width (multiple of 128) that exactly divides flat_padded."""
    for lane in (4096, 2048, 1024, 512, 256, 128):
        if flat_padded % lane == 0:
            return lane
    return 128   # unreachable: flat_padded is always a multiple of 128


def _pick_row_tile(total_rows, lane, itemsize, target_bytes):
    """Row tile: packed-sublane multiple, ~target bytes, ideally divides rows."""
    sub = {4: 8, 2: 16, 1: 32}.get(itemsize, 8)          # sublane packing
    rt = max(1, target_bytes // (lane * itemsize))
    if rt >= total_rows:
        return total_rows
    rt = max(sub, (rt // sub) * sub)
    if rt >= total_rows:
        return total_rows
    # Prefer an exact divisor of total_rows (avoids a masked tail block), but
    # never shrink the block by more than 2x just to get one.
    d = rt
    while d >= max(sub, rt // 2):
        if total_rows % d == 0:
            return d
        d -= sub
    return rt


def _drop_path_kernel(src_ref, scale_ref, x_ref, o_ref):
    # src_ref: (nb,) int32 in SMEM (scalar prefetch; consumed by index_maps).
    # scale_ref: (rt, 1) per-row scale; x_ref / o_ref: (rt, lane) in x.dtype.
    del src_ref
    o_ref[...] = x_ref[...] * scale_ref[...]


def drop_path(x, drop_prob: float = 0.0, training: bool = False,
              *, key=None, seed: int = 0, block_bytes=None):
    """Pallas implementation of drop_path_f for (N, ...) inputs."""
    if drop_prob == 0.0 or not training:
        return x

    keep_prob = 1.0 - drop_prob
    n = x.shape[0]
    flat = math.prod(x.shape[1:])

    # Per-sample Bernoulli scale, PyTorch semantics: floor(keep_prob + U[0,1)).
    # NOTE: pass a fresh `key` per layer / step; the default PRNGKey(seed)
    # would reuse identical drop decisions across calls.
    if key is None:
        key = jax.random.PRNGKey(seed)
    u = jax.random.uniform(key, (n,), dtype=jnp.float32)
    mask = jnp.floor(jnp.float32(keep_prob) + u)               # {0., 1.}
    scale = (mask / jnp.float32(keep_prob)).astype(x.dtype)    # 0 or 1/keep_prob

    # ---- Lane-dense flat view: (total_rows, lane) with lane % 128 == 0. ----
    flat_p = ((flat + 127) // 128) * 128
    x2 = x.reshape(n, flat)
    if flat_p != flat:
        # TODO(synk): padding costs one extra HBM copy; only hit when
        # prod(x.shape[1:]) is not a multiple of 128.
        x2 = jnp.pad(x2, ((0, 0), (0, flat_p - flat)))
    lane = _pick_lane(flat_p)
    rows_per_sample = flat_p // lane
    total_rows = n * rows_per_sample
    xr = x2.reshape(total_rows, lane)

    # Per-row scale (broadcast along lanes inside the kernel).
    scale_rows = jnp.repeat(scale, rows_per_sample).reshape(total_rows, 1)

    # ---- Tiling. ----
    itemsize = x.dtype.itemsize
    target_bytes, vmem_limit = _vmem_targets()
    if block_bytes is not None:
        target_bytes = block_bytes
    rt = _pick_row_tile(total_rows, lane, itemsize, target_bytes)
    nb = pl.cdiv(total_rows, rt)

    # ---- Dropped-block DMA skip (scalar-prefetched source block index). ----
    # For a block whose rows are ALL dropped, the x index_map returns the most
    # recently fetched block, so Pallas elides the input DMA; the stale data is
    # then multiplied by an all-zero scale block -> correct zeros.
    keep_row = jnp.repeat(mask > 0.0, rows_per_sample)          # (total_rows,)
    keep_row = jnp.pad(keep_row, (0, nb * rt - total_rows))     # tail -> False
    keep_blk = jnp.any(keep_row.reshape(nb, rt), axis=1)
    blk_idx = jnp.arange(nb, dtype=jnp.int32)
    src = lax.cummax(jnp.where(keep_blk, blk_idx, jnp.int32(-1)), axis=0)
    src = jnp.maximum(src, 0).astype(jnp.int32)                 # (nb,)

    x_spec = pl.BlockSpec((rt, lane), lambda i, src_ref: (src_ref[i], 0))
    s_spec = pl.BlockSpec((rt, 1), lambda i, src_ref: (i, 0))
    o_spec = pl.BlockSpec((rt, lane), lambda i, src_ref: (i, 0))

    cost = pl.CostEstimate(
        flops=total_rows * lane,
        transcendentals=0,
        bytes_accessed=2 * total_rows * lane * itemsize + total_rows * itemsize)

    out = pl.pallas_call(
        _drop_path_kernel,
        out_shape=jax.ShapeDtypeStruct((total_rows, lane), x.dtype),
        grid_spec=pltpu.PrefetchScalarGridSpec(
            num_scalar_prefetch=1,
            grid=(nb,),
            in_specs=[s_spec, x_spec],
            out_specs=o_spec,
        ),
        compiler_params=pltpu.CompilerParams(
            dimension_semantics=("parallel",),   # no carried state; megacore OK
            vmem_limit_bytes=vmem_limit,
        ),
        cost_estimate=cost,
        # input_output_aliases intentionally omitted: zero bandwidth benefit and
        # it would donate x, which callers (and the tests below) may still use.
    )(src, scale_rows, xr)

    out = out.reshape(n, flat_p)
    if flat_p != flat:
        out = out[:, :flat]
    return out.reshape(x.shape)


class DropPath:
    """Mirror of the PyTorch DropPath module (forward only)."""

    def __init__(self, drop_prob=None):
        self.drop_prob = drop_prob if drop_prob is not None else 0.0
        self.training = True

    def __call__(self, x, *, key=None, seed: int = 0):
        return drop_path(x, self.drop_prob, self.training, key=key, seed=seed)


if __name__ == "__main__":
    root = jax.random.PRNGKey(0)
    k_x1, k_x2, k_d1, k_d2 = jax.random.split(root, 4)

    # --- Test 1: basic shape (batch=2, C=4, 16x16), drop_prob=0.25. ---
    x1 = jax.random.normal(k_x1, (2, 4, 16, 16), dtype=jnp.float32)
    module = DropPath(drop_prob=0.25)
    module.training = True
    y1 = jax.block_until_ready(module(x1, key=k_d1))
    keep_prob = 1.0 - 0.25
    assert y1.shape == x1.shape and y1.dtype == x1.dtype
    assert bool(jnp.all(jnp.isfinite(y1)))
    # Each sample must be either all-zero (dropped) or exactly x / keep_prob.
    for b in range(x1.shape[0]):
        zeroed = bool(jnp.all(y1[b] == 0))
        scaled = bool(jnp.allclose(y1[b], x1[b] / keep_prob, rtol=1e-5, atol=1e-5))
        assert zeroed or scaled

    # --- Test 2: odd sample size (padding path) + multi-block grid +
    #     dropped-block DMA-skip index_map, drop_prob=0.5. ---
    x2 = jax.random.normal(k_x2, (16, 5, 11, 7), dtype=jnp.float32)   # flat=385
    y2 = jax.block_until_ready(
        drop_path(x2, 0.5, True, key=k_d2, block_bytes=16 * 1024))
    assert y2.shape == x2.shape and y2.dtype == x2.dtype
    for b in range(x2.shape[0]):
        zeroed = bool(jnp.all(y2[b] == 0))
        scaled = bool(jnp.allclose(y2[b], x2[b] / 0.5, rtol=1e-5, atol=1e-5))
        assert zeroed or scaled

    # --- Eval mode / drop_prob == 0 must be identity. ---
    module.training = False
    y_eval = jax.block_until_ready(module(x1, key=k_d1))
    assert bool(jnp.all(y_eval == x1))

    print("KERNEL_OK")
</pallas_src>

<mosaic_0001>
module attributes {stable_mosaic.version = 11 : i64} {
  func.func @_drop_path_kernel(%arg0: i32, %arg1: memref<1xi32, #tpu.memory_space<smem>>, %arg2: memref<2x1xf32, #tpu.memory_space<vmem>>, %arg3: memref<2x1024xf32, #tpu.memory_space<vmem>>, %arg4: memref<2x1024xf32, #tpu.memory_space<vmem>>) attributes {dimension_semantics = [#tpu.dimension_semantics<parallel>], iteration_bounds = array<i64: 1>, scalar_prefetch = 1 : i64, scratch_operands = 0 : i64, tpu.core_type = #tpu.core_type<tc>, window_params = [{transform_indices = @transform_0, window_bounds = array<i64: 2, 1>}, {transform_indices = @transform_1, window_bounds = array<i64: 2, 1024>}, {transform_indices = @transform_2, window_bounds = array<i64: 2, 1024>}]} {
    %c0 = arith.constant 0 : index
    %c0_0 = arith.constant 0 : index
    %0 = vector.load %arg3[%c0, %c0_0] : memref<2x1024xf32, #tpu.memory_space<vmem>>, vector<2x1024xf32>
    %c0_1 = arith.constant 0 : index
    %c0_2 = arith.constant 0 : index
    %1 = vector.load %arg2[%c0_1, %c0_2] : memref<2x1xf32, #tpu.memory_space<vmem>>, vector<2x1xf32>
    %2 = vector.broadcast %1 : vector<2x1xf32> to vector<2x1024xf32>
    %3 = arith.mulf %0, %2 : vector<2x1024xf32>
    %c0_3 = arith.constant 0 : index
    %c0_4 = arith.constant 0 : index
    %4 = vector.load %arg4[%c0_3, %c0_4] : memref<2x1024xf32, #tpu.memory_space<vmem>>, vector<2x1024xf32>
    tpu.vector_store %arg4[%c0_3, %c0_4], %3 {strides = array<i32>} : memref<2x1024xf32, #tpu.memory_space<vmem>>, vector<2x1024xf32>,
    return
  }
  func.func @transform_0(%arg0: i32, %arg1: memref<1xi32, #tpu.memory_space<smem>>) -> (i32, i32) {
    %c0_i32 = arith.constant 0 : i32
    %c0_i32_0 = arith.constant 0 : i32
    return %arg0, %c0_i32 : i32, i32
  }
  func.func @transform_1(%arg0: i32, %arg1: memref<1xi32, #tpu.memory_space<smem>>) -> (i32, i32) {
    %0 = arith.index_cast %arg0 : i32 to index
    %1 = memref.load %arg1[%0] : memref<1xi32, #tpu.memory_space<smem>>
    %c0_i32 = arith.constant 0 : i32
    %c0_i32_0 = arith.constant 0 : i32
    return %1, %c0_i32 : i32, i32
  }
  func.func @transform_2(%arg0: i32, %arg1: memref<1xi32, #tpu.memory_space<smem>>) -> (i32, i32) {
    %c0_i32 = arith.constant 0 : i32
    %c0_i32_0 = arith.constant 0 : i32
    return %arg0, %c0_i32 : i32, i32
  }
}

</mosaic_0001>

<bundles_post_ra>
// kernel: tpu_custom_call.1
= control target key start
LH: loop header
LB: loop body
LE: loop exit
PB: predicated region body
PF: predicated region fallthrough
CT: control target
= control target key end

     0   :  { %9 = vsyncpa [#allocation5], 0  ;;  %s176_s0 = inlined_call_operand.<no memory space> [shape: s32[1], index: 0, kind: input, shape index: {}]   ;;  %s177_s1 = inlined_call_operand.vmem [shape: f32[2,1], index: 1, kind: input, shape index: {}]   ;;  %s178_s2 = inlined_call_operand.hbm [shape: f32[2,1024], index: 2, kind: input, shape index: {}]   ;;  %s179_s3 = inlined_call_operand.hbm [shape: f32[2,1024], index: 3, kind: output, shape index: {}]  }
   0x1   :  { %10 = vsyncpa [#allocation6], 0  ;;  %s69_s14 = sshll.u32 %s176_s0, 8  ;;  %s125_s18 = smov [#allocation4]  }
   0x2   :  { %s21_s17 = scalar_lea.hbm %s178_s2, %s69_s14  ;;  %s23_s19 = sshll.u32 %s125_s18, 4  ;;  %s24_s19 = int_to_ptr.vmem [resolvable:$true] %s23_s19 }
   0x3   :  { %s75_s20 = scalar_lea.hbm %s21_s17, 256  ;;  %s77_s23 = scalar_lea.hbm %s178_s2, 256 }
   0x4   :  { %p76_p0 = scmp.ne.s32.totalorder %s21_s17, %s75_s20  ;;  %p78_p1 = scmp.lt.u32.totalorder %s21_s17, %s178_s2 }
   0x5   :  { %p79_p2 = scmp.lt.u32.totalorder %s77_s23, %s75_s20  ;;  %p81_p4 = scmp.lt.u32.totalorder %s75_s20, %s21_s17 }
   0x7   :  { %p80_p3 = por %p79_p2, %p78_p1 }
   0x9   :  { %p82_p5 = por %p81_p4, %p80_p3 }
   0xb   :  { %p83_p6 = pnand %p82_p5, %p76_p0 }
   0xd   :  { %86 = shalt.err (!%p83_p6)
}
   0xe   :  { %s87_s0 = scalar_lea.vmem %s24_s19, 256  ;;  %p92_p8 = scmp.lt.s32.totalorder %s24_s19, %s24_s19 }
   0xf   :  { %p88_p7 = scmp.ne.s32.totalorder %s24_s19, %s87_s0  ;;  %p93_p9 = scmp.lt.s32.totalorder %s87_s0, %s87_s0 }
  0x11   :  { %p94_p10 = por %p93_p9, %p92_p8 }
  0x13   :  { %p95_p11 = pnand %p94_p10, %p88_p7 }
  0x15   :  { %98 = shalt.err (!%p95_p11)
}
  0x16   :  { %26 = dma.hbm_to_vmem [thread:$0]  %s21_s17, 256, %s24_s19, [#allocation5]  }
  0x17   :  { %121 = dma.done.wait [#allocation5], 256  }
  0x18   :  { %122 = vsyncadd [#allocation5], 4294967040  ;;  %v126_v0 = vmov 0   ;;  %v33_v1 = vld [vmem:[%s177_s1] sm:$0x3]  ;;  %v41_v4 = vlaneseq  ;;  %v32_v10 = vld [vmem:[#allocation4 + $0x8] sm:$0xff] }
  0x19   :  { %74 = vset.pattern.permute.xlu0 %v126_v0  ;;  %v127_v2 = vmov 269488144   ;;  %v31_v9 = vld [vmem:[#allocation4] sm:$0xff]  ;;  %s128_s27 = smov [#allocation7]  }
  0x1a   :  { %36 = vperm.xlu0 %74, %v33_v1   ;;  %v39_v3 = vunpack.c.l.s4 %v127_v2  ;;  %v42_v6 = vshrl.u32 %v41_v4, 7  ;;  %s56_s28 = sshll.u32 %s128_s27, 4  ;;  %s57_s28 = int_to_ptr.vmem [resolvable:$true] %s56_s28 }
  0x1b   :  { %s99_s29 = scalar_lea.vmem %s57_s28, 256  ;;  %p104_p13 = scmp.lt.s32.totalorder %s57_s28, %s57_s28 }
  0x1c   :  { %v40_v5 = vunpack.c.0.s8 %v39_v3  ;;  %p100_p12 = scmp.ne.s32.totalorder %s57_s28, %s99_s29  ;;  %p105_p0 = scmp.lt.s32.totalorder %s99_s29, %s99_s29 }
  0x1e   :  { %v43_v7 = vsub.s32 %v40_v5, %v42_v6  ;;  %p106_p1 = por %p105_p0, %p104_p13 }
  0x20   :  { %p107_p2 = pnand %p106_p1, %p100_p12 }
  0x99   :  { %v37_v8 = vpop.permute.xlu0 %36 }
  0x9a   :  { %v44_v11 = vrot.slane %v37_v8, %v43_v7 }
  0x9c   :  { %v46_v12 = vmul.f32 %v44_v11, %v31_v9  ;;  %v47_v13 = vmul.f32 %v44_v11, %v32_v10 }
  0x9e   :  { %48 = vst [vmem:[#allocation7] sm:$0xff] %v46_v12  ;;  %49 = vst [vmem:[#allocation7 + $0x8] sm:$0xff] %v47_v13 }
  0x9f   :  { %110 = shalt.err (!%p107_p2)
}
  0xa0   :  { %s111_s4 = scalar_lea.hbm %s179_s3, 256 }
  0xa1   :  { %p112_p3 = scmp.ne.s32.totalorder %s179_s3, %s111_s4  ;;  %p115_p4 = scmp.lt.u32.totalorder %s111_s4, %s179_s3 }
  0xa3   :  { %p117_p5 = pnand %p115_p4, %p112_p3 }
  0xa5   :  { %120 = shalt.err (!%p117_p5)
}
  0xa6   :  { %59 = dma.vmem_to_hbm [thread:$0]  %s57_s28, 256, %s179_s3, [#allocation6]  }
  0xa7   :  { %123 = dma.done.wait [#allocation6], 256  }
  0xa8   :  { %124 = vsyncadd [#allocation6], 4294967040 }
  0xa9   :  { %63 = vsyncpa [#allocation5], 1 }
  0xaa   :  { %64 = vsyncpa [#allocation6], 1 }

</bundles_post_ra>
